<compile_context>
chip_gen: v6e
topology: v6e:2x2x1
jax: 0.10.0
libtpu: 0.0.40
codegen_flags: <defaults>
</compile_context>

<pallas_src>
import jax
import jax.numpy as jnp
from jax.experimental import pallas as pl
from jax.experimental.pallas import tpu as pltpu


def _input_norm1_kernel(x_ref, scale_ref, beta_ref, o_ref):
    # x_ref:     (TN, D)  lane-dense rows, D = C*F*F
    # scale_ref: (1, D)   f32 per-element scale (gamma repeated over spatial dims)
    # beta_ref:  (1, D)   f32 per-element bias (beta flattened)
    # o_ref:     (TN, D)
    xf = x_ref[...].astype(jnp.float32)
    o_ref[...] = (xf * scale_ref[...] + beta_ref[...]).astype(o_ref.dtype)


def _round_up(a, b):
    return ((a + b - 1) // b) * b


def _tpu_generation():
    """Best-effort TPU generation string: 'v5' / 'v6' / 'v7' / None."""
    try:
        kind = jax.devices()[0].device_kind.lower()
    except Exception:
        return None
    for g in ("v7", "v6", "v5"):
        if g in kind:
            return g
    return None


def input_norm1(x, gamma, beta, *, use_pallas=None):
    """Pallas implementation of InputNorm1.forward.

    Args:
      x:     (N, C, F, F)
      gamma: (C,)
      beta:  (C, F, F)
      use_pallas: force (True) / forbid (False) the Pallas path; None = auto
        (falls back to plain jnp for tiny inputs where kernel overhead dominates).
    Returns:
      (N, C, F, F), same dtype as x.
    """
    n, c, f1, f2 = x.shape
    assert gamma.shape == (c,)
    assert beta.shape == (c, f1, f2)
    d = c * f1 * f2

    gamma32 = gamma.astype(jnp.float32)
    beta32 = beta.astype(jnp.float32)

    # --- small-input fast path: XLA fuses this elementwise op for free -----
    x_bytes = x.size * jnp.dtype(x.dtype).itemsize
    if use_pallas is None:
        use_pallas = x_bytes >= (4 << 20)
    if not use_pallas:
        y = x.astype(jnp.float32) * gamma32.reshape(1, c, 1, 1) + beta32[None]
        return y.astype(x.dtype)

    # --- Pallas path --------------------------------------------------------
    # Lane-dense 2D views (contiguous reshapes, no HBM transpose).
    x2 = x.reshape(n, d)
    scale = jnp.repeat(gamma32, f1 * f2).reshape(1, d)   # matches (C,F,F)->D flatten
    beta2 = beta32.reshape(1, d)

    gen = _tpu_generation()
    # ~4 MiB blocks on v6e/v7x (double-buffered in+out = 16 MiB < 32 MiB scoped
    # default), 2 MiB on v5e / unknown (8 MiB < its 16 MiB scoped default).
    target_block_bytes = (4 << 20) if gen in ("v6", "v7") else (2 << 20)

    bytes_per_row = d * jnp.dtype(x.dtype).itemsize
    max_rows = max(8, ((target_block_bytes // bytes_per_row) // 8) * 8)
    tn = min(max_rows, _round_up(n, 8))

    # v7x: make sure a large batch gives the 2 TensorCores >= 2 parallel steps.
    if gen == "v7" and n >= 16 and pl.cdiv(n, tn) < 2:
        tn = max(8, _round_up(pl.cdiv(n, 2), 8))

    # Ragged grid: no batch padding, no output slice.  The last block's
    # out-of-range rows are handled by Pallas with masked writeback.
    grid = (pl.cdiv(n, tn),)

    out2 = pl.pallas_call(
        _input_norm1_kernel,
        out_shape=jax.ShapeDtypeStruct((n, d), x.dtype),
        grid=grid,
        in_specs=[
            pl.BlockSpec((tn, d), lambda i: (i, 0)),
            pl.BlockSpec((1, d), lambda i: (0, 0)),   # resident across grid
            pl.BlockSpec((1, d), lambda i: (0, 0)),   # resident across grid
        ],
        out_specs=pl.BlockSpec((tn, d), lambda i: (i, 0)),
        compiler_params=pltpu.CompilerParams(
            dimension_semantics=("parallel",),
        ),
    )(x2, scale, beta2)

    return out2.reshape(n, c, f1, f2)


def _reference(x, gamma, beta):
    # Pure-JAX reference mirroring the PyTorch forward.
    return x * gamma.reshape(1, -1, 1, 1) + beta[None]


if __name__ == "__main__":
    key = jax.random.PRNGKey(0)

    # ---- C == 3 branch (einsum path) ----
    N, C, F = 2, 3, 16
    kx, kg, kb = jax.random.split(key, 3)
    x3 = jax.random.normal(kx, (N, C, F, F), dtype=jnp.float32)
    # Module __init__ is gamma=ones, beta=zeros; perturb deterministically so
    # the test is non-trivial.
    gamma3 = jnp.ones((C,), jnp.float32) + 0.1 * jnp.arange(C, dtype=jnp.float32)
    beta3 = jnp.zeros((C, F, F), jnp.float32) + 0.01 * jax.random.normal(
        kb, (C, F, F), dtype=jnp.float32
    )

    y3 = input_norm1(x3, gamma3, beta3, use_pallas=True)   # force kernel path
    jax.block_until_ready(y3)
    ref3 = _reference(x3, gamma3, beta3)
    assert y3.shape == ref3.shape and y3.dtype == x3.dtype
    assert jnp.allclose(y3, ref3, atol=1e-5, rtol=1e-5)

    # Auto path (tiny input -> jnp fast path) must agree too.
    y3_auto = input_norm1(x3, gamma3, beta3)
    jax.block_until_ready(y3_auto)
    assert jnp.allclose(y3_auto, ref3, atol=1e-5, rtol=1e-5)

    # ---- C == 1 branch (scalar-gamma path), non-multiple-of-tn batch ----
    C1 = 1
    N1 = 5   # exercises the ragged last block / masked writeback
    x1 = jax.random.normal(kg, (N1, C1, F, F), dtype=jnp.float32)
    gamma1 = jnp.ones((C1,), jnp.float32) * 1.5
    beta1 = jnp.zeros((C1, F, F), jnp.float32) + 0.25

    y1 = input_norm1(x1, gamma1, beta1, use_pallas=True)
    jax.block_until_ready(y1)
    ref1 = _reference(x1, gamma1, beta1)
    assert y1.shape == ref1.shape and y1.dtype == x1.dtype
    assert jnp.allclose(y1, ref1, atol=1e-5, rtol=1e-5)

    print("KERNEL_OK")
</pallas_src>

<mosaic_0001>
module attributes {stable_mosaic.version = 11 : i64} {
  func.func @_input_norm1_kernel(%arg0: i32, %arg1: memref<8x768xf32, #tpu.memory_space<vmem>>, %arg2: memref<1x768xf32, #tpu.memory_space<vmem>>, %arg3: memref<1x768xf32, #tpu.memory_space<vmem>>, %arg4: memref<8x768xf32, #tpu.memory_space<vmem>>) attributes {dimension_semantics = [#tpu.dimension_semantics<parallel>], iteration_bounds = array<i64: 1>, scalar_prefetch = 0 : i64, scratch_operands = 0 : i64, tpu.core_type = #tpu.core_type<tc>, window_params = [{transform_indices = @transform_0, window_bounds = array<i64: 8, 768>}, {pipeline_mode = #tpu.pipeline_mode<synchronous>, transform_indices = @transform_1, window_bounds = array<i64: 1, 768>}, {pipeline_mode = #tpu.pipeline_mode<synchronous>, transform_indices = @transform_2, window_bounds = array<i64: 1, 768>}, {transform_indices = @transform_3, window_bounds = array<i64: 8, 768>}]} {
    %c0 = arith.constant 0 : index
    %c0_0 = arith.constant 0 : index
    %0 = vector.load %arg1[%c0, %c0_0] : memref<8x768xf32, #tpu.memory_space<vmem>>, vector<8x768xf32>
    %c0_1 = arith.constant 0 : index
    %c0_2 = arith.constant 0 : index
    %1 = vector.load %arg2[%c0_1, %c0_2] : memref<1x768xf32, #tpu.memory_space<vmem>>, vector<1x768xf32>
    %2 = vector.broadcast %1 : vector<1x768xf32> to vector<8x768xf32>
    %3 = arith.mulf %0, %2 : vector<8x768xf32>
    %c0_3 = arith.constant 0 : index
    %c0_4 = arith.constant 0 : index
    %4 = vector.load %arg3[%c0_3, %c0_4] : memref<1x768xf32, #tpu.memory_space<vmem>>, vector<1x768xf32>
    %5 = vector.broadcast %4 : vector<1x768xf32> to vector<8x768xf32>
    %6 = arith.addf %3, %5 : vector<8x768xf32>
    %c0_5 = arith.constant 0 : index
    %c0_6 = arith.constant 0 : index
    %7 = vector.load %arg4[%c0_5, %c0_6] : memref<8x768xf32, #tpu.memory_space<vmem>>, vector<8x768xf32>
    tpu.vector_store %arg4[%c0_5, %c0_6], %6 {strides = array<i32>} : memref<8x768xf32, #tpu.memory_space<vmem>>, vector<8x768xf32>,
    return
  }
  func.func @transform_0(%arg0: i32) -> (i32, i32) {
    %c0_i32 = arith.constant 0 : i32
    %c0_i32_0 = arith.constant 0 : i32
    return %arg0, %c0_i32 : i32, i32
  }
  func.func @transform_1(%arg0: i32) -> (i32, i32) {
    %c0_i32 = arith.constant 0 : i32
    %c0_i32_0 = arith.constant 0 : i32
    %c0_i32_1 = arith.constant 0 : i32
    return %c0_i32, %c0_i32_0 : i32, i32
  }
  func.func @transform_2(%arg0: i32) -> (i32, i32) {
    %c0_i32 = arith.constant 0 : i32
    %c0_i32_0 = arith.constant 0 : i32
    %c0_i32_1 = arith.constant 0 : i32
    return %c0_i32, %c0_i32_0 : i32, i32
  }
  func.func @transform_3(%arg0: i32) -> (i32, i32) {
    %c0_i32 = arith.constant 0 : i32
    %c0_i32_0 = arith.constant 0 : i32
    return %arg0, %c0_i32 : i32, i32
  }
}

</mosaic_0001>

<bundles_post_ra>
// kernel: tpu_custom_call.1
= control target key start
LH: loop header
LB: loop body
LE: loop exit
PB: predicated region body
PF: predicated region fallthrough
CT: control target
= control target key end

     0   :  { %8 = vsyncpa [#allocation3], 0  ;;  %s430_s0 = inlined_call_operand.hbm [shape: f32[2,768], index: 0, kind: input, shape index: {}]   ;;  %s431_s1 = inlined_call_operand.hbm [shape: f32[1,768], index: 1, kind: input, shape index: {}]   ;;  %s432_s2 = inlined_call_operand.hbm [shape: f32[1,768], index: 2, kind: input, shape index: {}]   ;;  %s433_s3 = inlined_call_operand.hbm [shape: f32[2,768], index: 3, kind: output, shape index: {}]  }
   0x1   :  { %9 = vsyncpa [#allocation6], 0 }
   0x2   :  { %10 = vsyncpa [#allocation4], 0 }
   0x3   :  { %15 = vsyncadd [#allocation3], 576  ;;  %s371_s12 = smov [#allocation5]   ;;  %s372_s14 = smov [#allocation2]  }
   0x4   :  { %s29_s13 = sshll.u32 %s371_s12, 4  ;;  %s16_s15 = sshll.u32 %s372_s14, 4  ;;  %s30_s13 = int_to_ptr.vmem [resolvable:$true] %s29_s13  ;;  %s17_s15 = int_to_ptr.vmem [resolvable:$true] %s16_s15 }
   0x5   :  { %s293_s16 = scalar_lea.vmem %s30_s13, 96  ;;  %p298_p1 = scmp.lt.s32.totalorder %s30_s13, %s30_s13 }
   0x6   :  { %p294_p0 = scmp.ne.s32.totalorder %s30_s13, %s293_s16  ;;  %p299_p2 = scmp.lt.s32.totalorder %s293_s16, %s293_s16 }
   0x8   :  { %p300_p3 = por %p299_p2, %p298_p1 }
   0xa   :  { %p301_p4 = pnand %p300_p3, %p294_p0 }
   0xc   :  { %304 = shalt.err (!%p301_p4)
}
   0xd   :  { %32 = dma.hbm_to_vmem [thread:$0]  %s431_s1, 96, %s30_s13, [#allocation6]  }
   0xe   :  { %s313_s19 = scalar_lea.vmem %s17_s15, 192  ;;  %s317_s20 = scalar_lea.vmem %s17_s15, 768 }
   0xf   :  { %p314_p5 = scmp.ne.s32.totalorder %s17_s15, %s313_s19  ;;  %p318_p6 = scmp.lt.s32.totalorder %s17_s15, %s17_s15 }
  0x10   :  { %p319_p7 = scmp.lt.s32.totalorder %s317_s20, %s313_s19 }
  0x12   :  { %p320_p8 = por %p319_p7, %p318_p6 }
  0x14   :  { %p321_p9 = pnand %p320_p8, %p314_p5 }
  0x16   :  { %324 = shalt.err (!%p321_p9)
}
  0x17   :  { %s373_s21 = smov 192   ;;  %s374_s22 = smov 12  }
  0x18   :  { %22 = dma.hbm_to_vmem [thread:$0]  %s430_s0, 192, %s17_s15, [#allocation3], %s373_s21, %s373_s21, %s374_s22  }
  0x19   :  { %s375_s25 = smov [#allocation7]  }
  0x1a   :  { %s39_s26 = sshll.u32 %s375_s25, 4  ;;  %s40_s26 = int_to_ptr.vmem [resolvable:$true] %s39_s26 }
  0x1b   :  { %s333_s1 = scalar_lea.vmem %s40_s26, 96  ;;  %p338_p11 = scmp.lt.s32.totalorder %s40_s26, %s40_s26 }
  0x1c   :  { %p334_p10 = scmp.ne.s32.totalorder %s40_s26, %s333_s1  ;;  %p339_p12 = scmp.lt.s32.totalorder %s333_s1, %s333_s1 }
  0x1e   :  { %p340_p13 = por %p339_p12, %p338_p11 }
  0x20   :  { %p341_p0 = pnand %p340_p13, %p334_p10 }
  0x22   :  { %344 = shalt.err (!%p341_p0)
}
  0x23   :  { %42 = dma.hbm_to_vmem [thread:$0]  %s432_s2, 96, %s40_s26, [#allocation6]  }
  0x24   :  { %365 = dma.done.wait [#allocation3], 768  }
  0x25   :  { %366 = vsyncadd [#allocation3], 4294966528 }
  0x26   :  { %367 = dma.done.wait [#allocation6], 192  }
  0x27   :  { %368 = vsyncadd [#allocation6], 4294967104  ;;  %v62_v0 = vlaneseq  ;;  %v376_v1 = vmov 1983009808   ;;  %v60_v11 = vld [vmem:[#allocation5] sm:$0x3f] }
  0x28   :  { %v91_v2 = vunpack.c.l.s4 %v376_v1  ;;  %v156_v13 = vld [vmem:[#allocation7] sm:$0x3f]  ;;  %v52_v34 = vld [vmem:[#allocation2] sm:$0xff]  ;;  %v53_v37 = vld [vmem:[#allocation2 + $0x8] sm:$0xf] }
  0x29   :  { %v63_v3 = vshrl.u32 %v62_v0, 7  ;;  %v54_v39 = vld [vmem:[#allocation2 + $0xc] sm:$0xff]  ;;  %v55_v48 = vld [vmem:[#allocation2 + $0x14] sm:$0xf]  ;;  %v56_v54 = vld [vmem:[#allocation2 + $0x18] sm:$0xff] }
  0x2a   :  { %v92_v4 = vunpack.c.0.s8 %v91_v2 }
  0x2b   :  { %v64_v5 = vsub.s32 0, %v63_v3  ;;  %v68_v6 = vsub.s32 1, %v63_v3  ;;  %v72_v7 = vsub.s32 2, %v63_v3  ;;  %v76_v8 = vsub.s32 3, %v63_v3 }
  0x2c   :  { %v80_v9 = vsub.s32 4, %v63_v3  ;;  %v84_v10 = vsub.s32 5, %v63_v3  ;;  %v410_v12 = vsub.s32 %v92_v4, %v63_v3  ;;  %v58_v3 = vld [vmem:[#allocation2 + $0x24] sm:$0xff] }
  0x2d   :  { %v65_v14 = vrot.slane %v60_v11, %v64_v5  ;;  %v69_v15 = vrot.slane %v60_v11, %v68_v6  ;;  %v73_v16 = vrot.slane %v60_v11, %v72_v7  ;;  %v77_v17 = vrot.slane %v60_v11, %v76_v8 }
  0x2e   :  { %v161_v18 = vrot.slane %v156_v13, %v64_v5  ;;  %v165_v19 = vrot.slane %v156_v13, %v68_v6  ;;  %v169_v20 = vrot.slane %v156_v13, %v72_v7  ;;  %v173_v21 = vrot.slane %v156_v13, %v76_v8  ;;  %v57_v5 = vld [vmem:[#allocation2 + $0x20] sm:$0xf] }
  0x2f   :  { %v86_v22 = vcombine.low %v65_v14, %v69_v15  ;;  %v88_v23 = vcombine.low %v73_v16, %v77_v17  ;;  %v81_v24 = vrot.slane %v60_v11, %v80_v9  ;;  %v85_v25 = vrot.slane %v60_v11, %v84_v10 }
  0x30   :  { %v182_v26 = vcombine.low %v161_v18, %v165_v19  ;;  %v184_v27 = vcombine.low %v169_v20, %v173_v21  ;;  %v177_v28 = vrot.slane %v156_v13, %v80_v9  ;;  %v181_v29 = vrot.slane %v156_v13, %v84_v10 }
  0x31   :  { %v96_v30 = vrot.slane %v86_v22, %v410_v12  ;;  %v110_v31 = vrot.slane %v88_v23, %v410_v12  ;;  %v122_v32 = vcombine.low %v81_v24, %v85_v25  ;;  %v87_v33 = vcombine.high %v65_v14, %v69_v15  ;;  %v59_v14 = vld [vmem:[#allocation2 + $0x2c] sm:$0xf] }
  0x32   :  { %v192_v35 = vrot.slane %v182_v26, %v410_v12  ;;  %v206_v36 = vrot.slane %v184_v27, %v410_v12  ;;  %v218_v38 = vcombine.low %v177_v28, %v181_v29  ;;  %v89_v40 = vcombine.high %v73_v16, %v77_v17 }
  0x33   :  { %v118_v41 = vcombine.low %v96_v30, %v110_v31  ;;  %v130_v42 = vrot.slane %v122_v32, %v410_v12  ;;  %v119_v43 = vcombine.high %v96_v30, %v110_v31  ;;  %v103_v44 = vrot.slane %v87_v33, %v410_v12 }
  0x34   :  { %v214_v45 = vcombine.low %v192_v35, %v206_v36  ;;  %v226_v46 = vrot.slane %v218_v38, %v410_v12  ;;  %v215_v47 = vcombine.high %v192_v35, %v206_v36  ;;  %v117_v49 = vrot.slane %v89_v40, %v410_v12 }
  0x35   :  { %v148_v50 = vmul.f32 %v118_v41, %v52_v34  ;;  %v149_v51 = vmul.f32 %v130_v42, %v53_v37  ;;  %v150_v52 = vmul.f32 %v119_v43, %v54_v39  ;;  %v138_v53 = vcombine.high %v130_v42, %v130_v42 }
  0x36   :  { %v234_v55 = vcombine.high %v226_v46, %v226_v46  ;;  %v120_v56 = vcombine.low %v103_v44, %v117_v49  ;;  %v183_v57 = vcombine.high %v161_v18, %v165_v19  ;;  %v185_v58 = vcombine.high %v169_v20, %v173_v21 }
  0x37   :  { %v244_v59 = vadd.f32 %v214_v45, %v148_v50  ;;  %v245_v60 = vadd.f32 %v226_v46, %v149_v51  ;;  %v246_v61 = vadd.f32 %v215_v47, %v150_v52  ;;  %v151_v62 = vmul.f32 %v138_v53, %v55_v48 }
  0x38   :  { %v152_v63 = vmul.f32 %v120_v56, %v56_v54  ;;  %v199_v0 = vrot.slane %v183_v57, %v410_v12  ;;  %v213_v1 = vrot.slane %v185_v58, %v410_v12  ;;  %v123_v2 = vcombine.high %v81_v24, %v85_v25 }
  0x39   :  { %252 = vst [vmem:[#allocation8] sm:$0xff] %v244_v59  ;;  %253 = vst [vmem:[#allocation8 + $0x8] sm:$0xf] %v245_v60  ;;  %v247_v4 = vadd.f32 %v234_v55, %v151_v62  ;;  %v219_v6 = vcombine.high %v177_v28, %v181_v29  ;;  %v121_v7 = vcombine.high %v103_v44, %v117_v49 }
  0x3a   :  { %254 = vst [vmem:[#allocation8 + $0xc] sm:$0xff] %v246_v61  ;;  %v216_v8 = vcombine.low %v199_v0, %v213_v1  ;;  %v137_v9 = vrot.slane %v123_v2, %v410_v12  ;;  %v217_v10 = vcombine.high %v199_v0, %v213_v1 }
  0x3b   :  { %255 = vst [vmem:[#allocation8 + $0x14] sm:$0xf] %v247_v4  ;;  %v233_v11 = vrot.slane %v219_v6, %v410_v12  ;;  %v154_v13 = vmul.f32 %v121_v7, %v58_v3 }
  0x3c   :  { %v248_v15 = vadd.f32 %v216_v8, %v152_v63  ;;  %v153_v16 = vmul.f32 %v137_v9, %v57_v5  ;;  %v139_v17 = vcombine.high %v137_v9, %v137_v9 }
  0x3d   :  { %v250_v18 = vadd.f32 %v217_v10, %v154_v13  ;;  %v235_v19 = vcombine.high %v233_v11, %v233_v11 }
  0x3e   :  { %256 = vst [vmem:[#allocation8 + $0x18] sm:$0xff] %v248_v15  ;;  %v249_v20 = vadd.f32 %v233_v11, %v153_v16  ;;  %v155_v21 = vmul.f32 %v139_v17, %v59_v14 }
  0x3f   :  { %258 = vst [vmem:[#allocation8 + $0x24] sm:$0xff] %v250_v18 }
  0x40   :  { %257 = vst [vmem:[#allocation8 + $0x20] sm:$0xf] %v249_v20  ;;  %v251_v22 = vadd.f32 %v235_v19, %v155_v21 }
  0x42   :  { %259 = vst [vmem:[#allocation8 + $0x2c] sm:$0xf] %v251_v22 }
  0x43   :  { %264 = vsyncadd [#allocation4], 576  ;;  %s377_s0 = smov [#allocation8]  }
  0x44   :  { %s265_s2 = sshll.u32 %s377_s0, 4  ;;  %s266_s2 = int_to_ptr.vmem [resolvable:$true] %s265_s2 }
  0x45   :  { %s345_s29 = scalar_lea.vmem %s266_s2, 192  ;;  %s349_s30 = scalar_lea.vmem %s266_s2, 768 }
  0x46   :  { %p346_p1 = scmp.ne.s32.totalorder %s266_s2, %s345_s29  ;;  %p350_p2 = scmp.lt.s32.totalorder %s266_s2, %s266_s2 }
  0x47   :  { %p351_p3 = scmp.lt.s32.totalorder %s349_s30, %s345_s29 }
  0x49   :  { %p352_p4 = por %p351_p3, %p350_p2 }
  0x4b   :  { %p353_p5 = pnand %p352_p4, %p346_p1 }
  0x4d   :  { %356 = shalt.err (!%p353_p5)
}
  0x4e   :  { %271 = dma.vmem_to_hbm [thread:$0]  %s266_s2, 192, %s433_s3, [#allocation4], %s373_s21, %s373_s21, %s374_s22  }
  0x4f   :  { %369 = dma.done.wait [#allocation4], 768  }
  0x50   :  { %370 = vsyncadd [#allocation4], 4294966528 }
  0x51   :  { %275 = vsyncpa [#allocation3], 1 }
  0x52   :  { %276 = vsyncpa [#allocation6], 1 }
  0x53   :  { %277 = vsyncpa [#allocation4], 1 }

</bundles_post_ra>
